<compile_context>
chip_gen: v5e
topology: v5e:2x2
jax: 0.10.0
libtpu: 0.0.40
codegen_flags: <defaults>
</compile_context>

<pallas_src>
import jax
import jax.numpy as jnp
from jax import lax
from jax.experimental import pallas as pl
from jax.experimental.pallas import tpu as pltpu


def _round_up(x, m):
    return ((x + m - 1) // m) * m


def _fcn3_kernel(x_ref, m_ref, o_ref):
    # x_ref: (TILE_P, n*d)  flattened batch tile of X (lane-dense rows)
    # m_ref: (E, n*d)       collapsed + n-replicated weights (resident block)
    # o_ref: (E, TILE_P)    lane-dense output tile (transposed layout)
    o_ref[...] = lax.dot_general(
        m_ref[...], x_ref[...],
        dimension_numbers=(((1,), (1,)), ((), ())),   # contract both last dims
        preferred_element_type=jnp.float32,
    ).astype(o_ref.dtype)


def fcn3_forward(X, W0, W1, A, *, stream_dtype=None):
    """Ensemble FCN3 forward pass (linear activations, zero biases).

    out[u, i] = sum_{j,k,l,n} A[i,j] W1[i,j,k] W0[i,k,l] X[u,n,l]

    X: (P, n, d); W0: (E, n1, d); W1: (E, n2, n1); A: (E, n2)  ->  (P, E) f32.
    """
    P, n, d = X.shape
    E = W0.shape[0]
    K = n * d

    if stream_dtype is None:
        stream_dtype = X.dtype
    itemsize = jnp.dtype(stream_dtype).itemsize

    # ---- Algebraic collapse (exact: every layer is linear, biases zero). ----
    # M[i, l] = sum_{j,k} A[i,j] W1[i,j,k] W0[i,k,l]  -> (E, d), once, in f32.
    M = jnp.einsum("ij,ijk->ik", A.astype(jnp.float32), W1.astype(jnp.float32))
    M = jnp.einsum("ik,ikl->il", M, W0.astype(jnp.float32))           # (E, d)
    # Fold the n-reduction of X into the matmul: replicate M along the
    # flattened (n, d) axis so  out^T = Mrep @ X_flat^T  with K = n*d.
    Mrep = jnp.tile(M, (1, n)).astype(stream_dtype)                   # (E, n*d)

    # ---- Generation-aware tile sizing / VMEM budget. ----
    try:
        vmem_phys = int(pltpu.get_tpu_info().vmem_capacity_bytes)
    except Exception:
        vmem_phys = 64 << 20                     # conservative: v7x per-TC size
    vmem_budget = (vmem_phys * 3) // 4           # leave compiler headroom
    # Per-buffer X target big enough to amortize the ~600-cycle grid-step
    # overhead; a bit smaller on v7x (64 MiB physical) than on v5e/v6e.
    x_target = (12 << 20) if vmem_phys <= (64 << 20) else (16 << 20)

    row_bytes = K * itemsize
    e_pad = _round_up(E, 8)
    k_pad = _round_up(K, 128)

    def footprint(tp):
        x_b = tp * k_pad * itemsize              # double-buffered X tile
        o_b = e_pad * tp * 4                     # double-buffered output tile
        m_b = e_pad * k_pad * itemsize           # resident weights
        return 2 * (x_b + o_b) + 2 * m_b

    # Keep enough grid steps for megacore sharding (>=2, ideally 4) when the
    # batch allows it; never grow a tile past what the batch needs.
    if P >= 4 * 128:
        min_steps = 4
    elif P >= 2 * 128:
        min_steps = 2
    else:
        min_steps = 1
    tp_cap = max(128, _round_up(-(-P // min_steps), 128))

    tp = 128                                     # multiple of 128: lane-dense out
    while (tp * 2 <= tp_cap
           and tp * 2 * row_bytes <= x_target
           and footprint(tp * 2) + (2 << 20) <= vmem_budget):
        tp *= 2
    while tp > 128 and footprint(tp) + (2 << 20) > vmem_budget:
        tp //= 2

    P_pad = _round_up(P, tp)
    if P_pad != P:
        X = jnp.pad(X, ((0, P_pad - P), (0, 0), (0, 0)))
    X_flat = X.reshape(P_pad, K).astype(stream_dtype)                 # (P_pad, n*d)

    required = footprint(tp) + (2 << 20)
    # Clamp to a per-generation ceiling, never below the computed requirement.
    vmem_limit = int(max(required, min(vmem_budget, required + (4 << 20))))

    grid = (P_pad // tp,)

    out_t = pl.pallas_call(
        _fcn3_kernel,
        out_shape=jax.ShapeDtypeStruct((E, P_pad), jnp.float32),
        grid=grid,
        in_specs=[
            pl.BlockSpec((tp, K), lambda i: (i, 0)),      # X batch tile (2-D)
            pl.BlockSpec((E, K), lambda i: (0, 0)),       # Mrep, resident
        ],
        out_specs=pl.BlockSpec((E, tp), lambda i: (0, i)),  # lane-dense output
        compiler_params=pltpu.CompilerParams(
            dimension_semantics=("parallel",),            # shard P tiles (v7x)
            vmem_limit_bytes=vmem_limit,
        ),
    )(X_flat, Mrep)

    return jnp.transpose(out_t)[:P]                                   # (P, E)


if __name__ == "__main__":
    # Small shapes consistent with the module hyperparameters.
    d, n1, n2 = 16, 32, 16          # input_dim, hidden_width_1, hidden_width_2
    ensembles = 2
    var = (1.0, 1.0, 1.0)           # weight_sigma1..3 (biases are zero)

    key = jax.random.PRNGKey(0)
    k_w0, k_w1, k_a, k_x1, k_x2 = jax.random.split(key, 5)

    W0 = jax.random.normal(k_w0, (ensembles, n1, d), jnp.float32) * (var[0] ** 0.5)
    W1 = jax.random.normal(k_w1, (ensembles, n2, n1), jnp.float32) * (var[1] ** 0.5)
    A = jax.random.normal(k_a, (ensembles, n2), jnp.float32) * (var[2] ** 0.5)

    # Case 1: tiny batch (single grid step).
    P, n_extra = 8, 4
    X = jax.random.normal(k_x1, (P, n_extra, d), jnp.float32)
    out = jax.block_until_ready(fcn3_forward(X, W0, W1, A))
    ref = jnp.einsum("ij,ijk,ikl,unl->ui", A, W1, W0, X)
    assert out.shape == (P, ensembles)
    assert jnp.allclose(out, ref, rtol=1e-4, atol=1e-4), "mismatch (small batch)"

    # Case 2: batch that exercises padding + a multi-step grid.
    P2 = 260
    X2 = jax.random.normal(k_x2, (P2, n_extra, d), jnp.float32)
    out2 = jax.block_until_ready(fcn3_forward(X2, W0, W1, A))
    ref2 = jnp.einsum("ij,ijk,ikl,unl->ui", A, W1, W0, X2)
    assert out2.shape == (P2, ensembles)
    assert jnp.allclose(out2, ref2, rtol=1e-4, atol=1e-4), "mismatch (multi-tile)"

    print("KERNEL_OK")
</pallas_src>

<mosaic_0001>
module attributes {stable_mosaic.version = 11 : i64} {
  func.func @_fcn3_kernel(%arg0: i32, %arg1: memref<128x64xf32, #tpu.memory_space<vmem>>, %arg2: memref<2x64xf32, #tpu.memory_space<vmem>>, %arg3: memref<2x128xf32, #tpu.memory_space<vmem>>) attributes {dimension_semantics = [#tpu.dimension_semantics<parallel>], iteration_bounds = array<i64: 1>, scalar_prefetch = 0 : i64, scratch_operands = 0 : i64, tpu.core_type = #tpu.core_type<tc>, window_params = [{transform_indices = @transform_0, window_bounds = array<i64: 128, 64>}, {pipeline_mode = #tpu.pipeline_mode<synchronous>, transform_indices = @transform_1, window_bounds = array<i64: 2, 64>}, {transform_indices = @transform_2, window_bounds = array<i64: 2, 128>}]} {
    %c0 = arith.constant 0 : index
    %c0_0 = arith.constant 0 : index
    %0 = vector.load %arg2[%c0, %c0_0] : memref<2x64xf32, #tpu.memory_space<vmem>>, vector<2x64xf32>
    %c0_1 = arith.constant 0 : index
    %c0_2 = arith.constant 0 : index
    %1 = vector.load %arg1[%c0_1, %c0_2] : memref<128x64xf32, #tpu.memory_space<vmem>>, vector<128x64xf32>
    %cst = arith.constant dense<0.000000e+00> : vector<2x128xf32>
    %2 = tpu.matmul %0, %1, %cst {dimension_numbers = #tpu.dot_dimension_numbers<[1], [1], [0], [0], [0, 0, 1, 0], [], []>} : vector<2x64xf32>, vector<128x64xf32>, vector<2x128xf32> -> vector<2x128xf32>
    %c0_3 = arith.constant 0 : index
    %c0_4 = arith.constant 0 : index
    %3 = vector.load %arg3[%c0_3, %c0_4] : memref<2x128xf32, #tpu.memory_space<vmem>>, vector<2x128xf32>
    tpu.vector_store %arg3[%c0_3, %c0_4], %2 {strides = array<i32>} : memref<2x128xf32, #tpu.memory_space<vmem>>, vector<2x128xf32>,
    return
  }
  func.func @transform_0(%arg0: i32) -> (i32, i32) {
    %c0_i32 = arith.constant 0 : i32
    %c0_i32_0 = arith.constant 0 : i32
    return %arg0, %c0_i32 : i32, i32
  }
  func.func @transform_1(%arg0: i32) -> (i32, i32) {
    %c0_i32 = arith.constant 0 : i32
    %c0_i32_0 = arith.constant 0 : i32
    %c0_i32_1 = arith.constant 0 : i32
    return %c0_i32, %c0_i32_0 : i32, i32
  }
  func.func @transform_2(%arg0: i32) -> (i32, i32) {
    %c0_i32 = arith.constant 0 : i32
    %c0_i32_0 = arith.constant 0 : i32
    return %c0_i32, %arg0 : i32, i32
  }
}

</mosaic_0001>

<bundles_post_ra>
// kernel: tpu_custom_call.1
= control target key start
LH: loop header
LB: loop body
LE: loop exit
PB: predicated region body
PF: predicated region fallthrough
CT: control target
= control target key end

     0   :  { %vm29_vm0 = vcmask 523264   ;;  %s249_s0 = inlined_call_operand.vmem [shape: f32[128,64], index: 0, kind: input, shape index: {}]   ;;  %s250_s1 = inlined_call_operand.vmem [shape: f32[2,64], index: 1, kind: input, shape index: {}]   ;;  %s251_s2 = inlined_call_operand.hbm [shape: f32[2,128], index: 2, kind: output, shape index: {}]  }
   0x1   :  { %v28_v0 = vld [vmem:[%s249_s0 + $0x78] sm:$0xff]  ;;  %v27_v1 = vld [vmem:[%s249_s0 + $0x70] sm:$0xff] }
   0x2   :  { %118 = vmatpush.xpose.msk.msra.mxu0 %vm29_vm0, %v28_v0 }
   0x3   :  { %7 = vsyncpa [#allocation3], 0  ;;  %v26_v2 = vld [vmem:[%s249_s0 + $0x68] sm:$0xff]  ;;  %v25_v3 = vld [vmem:[%s249_s0 + $0x60] sm:$0xff]  ;;  %s162_s15 = smov [#allocation2]   ;;  %s109_s19 = sshll.u32 %s251_s2, 4  ;;  %s110_s19 = int_to_ptr.hbm [resolvable:$true] %s109_s19 }
   0x4   :  { %v24_v4 = vld [vmem:[%s249_s0 + $0x58] sm:$0xff]  ;;  %v23_v5 = vld [vmem:[%s249_s0 + $0x50] sm:$0xff]  ;;  %v22_v6 = vld [vmem:[%s249_s0 + $0x48] sm:$0xff]  ;;  %s107_s16 = sshll.u32 %s162_s15, 4  ;;  %s108_s16 = int_to_ptr.vmem [resolvable:$true] %s107_s16 }
   0x5   :  { %v21_v7 = vld [vmem:[%s249_s0 + $0x40] sm:$0xff]  ;;  %v20_v8 = vld [vmem:[%s249_s0 + $0x38] sm:$0xff]  ;;  %v19_v9 = vld [vmem:[%s249_s0 + $0x30] sm:$0xff] }
   0x6   :  { %119 = vmatpush.xpose.msk.msra.mxu0 %vm29_vm0, %v27_v1  ;;  %v18_v10 = vld [vmem:[%s249_s0 + $0x28] sm:$0xff]  ;;  %v17_v11 = vld [vmem:[%s249_s0 + $0x20] sm:$0xff]  ;;  %v16_v12 = vld [vmem:[%s249_s0 + $0x18] sm:$0xff] }
   0x7   :  { %v15_v13 = vld [vmem:[%s249_s0 + $0x10] sm:$0xff]  ;;  %v14_v14 = vld [vmem:[%s249_s0 + $0x8] sm:$0xff]  ;;  %v13_v15 = vld [vmem:[%s249_s0] sm:$0xff] }
   0x8   :  { %v12_v16 = vld [vmem:[%s250_s1] sm:$0x3] }
   0xa   :  { %120 = vmatpush.xpose.msk.msra.mxu0 %vm29_vm0, %v26_v2 }
   0xe   :  { %121 = vmatpush.xpose.msk.msra.mxu0 %vm29_vm0, %v25_v3 }
  0x12   :  { %122 = vmatpush.xpose.msk.msra.mxu0 %vm29_vm0, %v24_v4 }
  0x16   :  { %123 = vmatpush.xpose.msk.msra.mxu0 %vm29_vm0, %v23_v5 }
  0x1a   :  { %124 = vmatpush.xpose.msk.msra.mxu0 %vm29_vm0, %v22_v6 }
  0x1e   :  { %125 = vmatpush.xpose.msk.msra.mxu0 %vm29_vm0, %v21_v7 }
  0x22   :  { %126 = vmatpush.xpose.msk.msra.mxu0 %vm29_vm0, %v20_v8 }
  0x26   :  { %127 = vmatpush.xpose.msk.msra.mxu0 %vm29_vm0, %v19_v9 }
  0x2a   :  { %128 = vmatpush.xpose.msk.msra.mxu0 %vm29_vm0, %v18_v10 }
  0x2e   :  { %129 = vmatpush.xpose.msk.msra.mxu0 %vm29_vm0, %v17_v11 }
  0x32   :  { %130 = vmatpush.xpose.msk.msra.mxu0 %vm29_vm0, %v16_v12 }
  0x36   :  { %131 = vmatpush.xpose.msk.msra.mxu0 %vm29_vm0, %v15_v13 }
  0x3a   :  { %132 = vmatpush.xpose.msk.msra.mxu0 %vm29_vm0, %v14_v14 }
  0x3e   :  { %133 = vmatpush.xpose.msk.msra.mxu0 %vm29_vm0, %v13_v15 }
  0x41   :  { %134 = vmatmul.msk.f32.vlgmr.msra.gmra.mxu0 %vm29_vm0, %v12_v16 }
  0xbe   :  { %v98_v17 = vpop.f32.mrf.mxu0 }
  0xbf   :  { %101 = vst [vmem:[#allocation2] sm:$0x3] %v98_v17 }
  0xc0   :  { %112 = dma.vmem_to_hbm [thread:$0]  %s108_s16, 32, %s110_s19, [#allocation3]  }
  0xc1   :  { %160 = dma.done.wait [#allocation3], 32  }
  0xc2   :  { %161 = vsyncadd [#allocation3], 4294967264 }
  0xc3   :  { %117 = vsyncpa [#allocation3], 1 }

</bundles_post_ra>
